<compile_context>
chip_gen: v7x
topology: tpu7x:2x2x1
jax: 0.10.0
libtpu: 0.0.40
codegen_flags: <defaults>
</compile_context>

<pallas_src>
import functools

import jax
import jax.numpy as jnp
from jax.experimental import pallas as pl
from jax.experimental.pallas import tpu as pltpu

OUT_DIM = 2          # logits
OUT_PAD = 128        # MXU-side padded width of the output projection
BN_EPS = 1e-5
_MAX_TILE_B = 2048   # batch-tile cap (VMEM footprint ~3 MiB at this size)


def _round_up(x, m):
    return (x + m - 1) // m * m


def _choose_tile_b(B):
    """Batch tile: multiple of 8, <= _MAX_TILE_B, small padding waste, and
    >= 2 grid steps when B >= 16 (so the parallel axis splits across v7x TCs)."""
    b8 = _round_up(B, 8)
    if b8 <= _MAX_TILE_B:
        if B < 16:
            return b8                               # grid=(1,), tiny problem
        return _round_up(pl.cdiv(b8, 2), 8)         # grid=(2,)
    # Large B: biggest power-of-two tile whose padding waste is small.
    for t in (2048, 1024, 512, 256, 128, 64, 32, 16, 8):
        waste = _round_up(B, t) - B
        if waste <= max(8, B // 16):                # <= ~6.25% padded rows
            return t
    return 8


def mlp_only_kernel(x_ref, w1_ref, b1_ref, w2_ref, b2_ref, w3_ref, b3_ref, o_ref):
    """Fused MLP: relu(relu(x@W1'+b1') @ W2'+b2') @ W3p + b3p, store [:, :2].

    BN already folded into W1'/b1' and W2'/b2'.  W3p/b3p are zero-padded to
    128 lanes for the MXU; only the first OUT_DIM lanes are written to HBM.
    """
    x = x_ref[...]                                                  # (TB, D_in)

    h = jnp.dot(x, w1_ref[...], preferred_element_type=jnp.float32) + b1_ref[...]
    h = jnp.maximum(h, 0.0)                                         # (TB, D1) f32
    if h.dtype != w2_ref.dtype:
        h = h.astype(w2_ref.dtype)                                  # bf16 path only

    h = jnp.dot(h, w2_ref[...], preferred_element_type=jnp.float32) + b2_ref[...]
    h = jnp.maximum(h, 0.0)                                         # (TB, D2) f32
    if h.dtype != w3_ref.dtype:
        h = h.astype(w3_ref.dtype)                                  # bf16 path only

    logits = (
        jnp.dot(h, w3_ref[...], preferred_element_type=jnp.float32) + b3_ref[...]
    )                                                               # (TB, OUT_PAD)
    o_ref[...] = logits[:, :OUT_DIM]                                # narrow store


def _fold_bn(w, b, gamma, beta, mean, var, eps=BN_EPS):
    """Fold eval-mode BatchNorm1d following Linear(w: (in,out), b: (1,out))."""
    inv = gamma * jax.lax.rsqrt(var + eps)          # (1, out)
    w_f = w * inv                                   # broadcast over rows
    b_f = (b - mean) * inv + beta                   # (1, out)
    return w_f, b_f


@functools.partial(jax.jit, static_argnames=("tile_b", "use_bf16"))
def mlp_only_forward(x, params, *, tile_b=None, use_bf16=False):
    """x: (B, mlp_input_dim) float32. params: dict of raw module parameters."""
    B, d_in = x.shape
    d1 = params["w1"].shape[1]
    d2 = params["w2"].shape[1]

    # --- wrapper-side prep (cheap, fused by XLA) -----------------------------
    w1f, b1f = _fold_bn(params["w1"], params["b1"], params["g1"],
                        params["beta1"], params["m1"], params["v1"])
    w2f, b2f = _fold_bn(params["w2"], params["b2"], params["g2"],
                        params["beta2"], params["m2"], params["v2"])
    # MXU-friendly output projection: zero-pad (d2, 2) -> (d2, 128)
    w3p = jnp.zeros((d2, OUT_PAD), jnp.float32).at[:, :OUT_DIM].set(params["w3"])
    b3p = jnp.zeros((1, OUT_PAD), jnp.float32).at[:, :OUT_DIM].set(params["b3"])

    if use_bf16:
        # TODO(synk): bf16 operands halve the dominant x/weight HBM reads and
        # hit the native bf16 MXU path on v5e/v6e/v7x, but bf16 rounding does
        # not reliably hold 1e-4 vs. the f32 reference; enable only when that
        # tolerance is relaxed.  Biases / ReLU / accumulation stay f32.
        x = x.astype(jnp.bfloat16)
        w1f = w1f.astype(jnp.bfloat16)
        w2f = w2f.astype(jnp.bfloat16)
        w3p = w3p.astype(jnp.bfloat16)

    # --- batch tiling ---------------------------------------------------------
    if tile_b is None:
        tile_b = _choose_tile_b(B)
    tile_b = max(8, _round_up(tile_b, 8))
    b_pad = _round_up(B, tile_b)
    if b_pad != B:
        # forward is row-independent -> zero-padding extra rows is safe
        x = jnp.pad(x, ((0, b_pad - B), (0, 0)))
    grid = (b_pad // tile_b,)

    resident = lambda i: (0, 0)           # weights: same block every iteration
    in_specs = [
        pl.BlockSpec((tile_b, d_in), lambda i: (i, 0)),   # x: tiled over batch
        pl.BlockSpec((d_in, d1), resident),
        pl.BlockSpec((1, d1), resident),
        pl.BlockSpec((d1, d2), resident),
        pl.BlockSpec((1, d2), resident),
        pl.BlockSpec((d2, OUT_PAD), resident),
        pl.BlockSpec((1, OUT_PAD), resident),
    ]
    out_specs = pl.BlockSpec((tile_b, OUT_DIM), lambda i: (i, 0))

    flops = 2 * b_pad * (d_in * d1 + d1 * d2 + d2 * OUT_PAD)
    bytes_accessed = (
        x.dtype.itemsize * b_pad * d_in                       # x
        + w1f.dtype.itemsize * (d_in * d1 + d1 * d2 + d2 * OUT_PAD)  # weights
        + 4 * (d1 + d2 + OUT_PAD)                             # f32 biases
        + 4 * b_pad * OUT_DIM                                 # narrow output
    )

    out = pl.pallas_call(
        mlp_only_kernel,
        out_shape=jax.ShapeDtypeStruct((b_pad, OUT_DIM), jnp.float32),
        grid=grid,
        in_specs=in_specs,
        out_specs=out_specs,
        compiler_params=pltpu.CompilerParams(
            dimension_semantics=("parallel",)),   # megacore split on v7x
        cost_estimate=pl.CostEstimate(
            flops=flops, transcendentals=0, bytes_accessed=bytes_accessed),
    )(x, w1f, b1f, w2f, b2f, w3p, b3p)

    return out[:B]


def init_params(key, mlp_input_dim, dim1, dim2):
    """Deterministic synthetic parameters matching MLP_out's shapes.

    Linear weights are stored as (in, out) — the transpose of PyTorch's
    nn.Linear.weight — so the kernel computes x @ W + b.
    BatchNorm params: gamma, beta, running_mean, running_var (eval-mode use).
    """
    ks = jax.random.split(key, 10)
    scale = 0.05
    params = {
        # fc1 + bn1
        "w1": scale * jax.random.normal(ks[0], (mlp_input_dim, dim1), jnp.float32),
        "b1": scale * jax.random.normal(ks[1], (1, dim1), jnp.float32),
        "g1": 1.0 + 0.1 * jax.random.normal(ks[2], (1, dim1), jnp.float32),
        "beta1": 0.1 * jax.random.normal(ks[3], (1, dim1), jnp.float32),
        "m1": 0.1 * jax.random.normal(ks[8], (1, dim1), jnp.float32),
        "v1": 1.0 + 0.1 * jax.random.uniform(ks[9], (1, dim1), jnp.float32),
        # fc2 + bn2
        "w2": scale * jax.random.normal(ks[4], (dim1, dim2), jnp.float32),
        "b2": scale * jax.random.normal(ks[5], (1, dim2), jnp.float32),
        "g2": 1.0 + 0.1 * jax.random.normal(ks[6], (1, dim2), jnp.float32),
        "beta2": 0.1 * jax.random.normal(ks[7], (1, dim2), jnp.float32),
        "m2": jnp.zeros((1, dim2), jnp.float32),
        "v2": jnp.ones((1, dim2), jnp.float32),
        # out
        "w3": scale * jax.random.normal(jax.random.PRNGKey(123), (dim2, OUT_DIM), jnp.float32),
        "b3": scale * jax.random.normal(jax.random.PRNGKey(321), (1, OUT_DIM), jnp.float32),
    }
    return params


def reference_forward(x, p):
    """Pure-JAX reference of the same eval-mode forward (un-folded BN)."""
    eps = BN_EPS
    h = x @ p["w1"] + p["b1"]
    h = (h - p["m1"]) / jnp.sqrt(p["v1"] + eps) * p["g1"] + p["beta1"]
    h = jnp.maximum(h, 0.0)
    h = h @ p["w2"] + p["b2"]
    h = (h - p["m2"]) / jnp.sqrt(p["v2"] + eps) * p["g2"] + p["beta2"]
    h = jnp.maximum(h, 0.0)
    return h @ p["w3"] + p["b3"]


if __name__ == "__main__":
    # Small shapes consistent with the module: mlp_input_dim=32,
    # mlp_dim1=128, mlp_dim2=64, output logits dim=2.
    B, D_IN, D1, D2 = 8, 32, 128, 64

    key = jax.random.PRNGKey(0)
    kx, kp = jax.random.split(key)
    x = jax.random.normal(kx, (B, D_IN), jnp.float32)
    params = init_params(kp, D_IN, D1, D2)

    out = jax.block_until_ready(mlp_only_forward(x, params))
    ref = reference_forward(x, params)
    assert out.shape == (B, OUT_DIM)
    assert jnp.allclose(out, ref, atol=1e-4, rtol=1e-4), "mismatch vs JAX reference"

    # Second case: batch not a tile multiple -> exercises padding + grid=(2,)
    # (megacore path) + the narrow (tile_b, 2) output blocks.
    B2 = 520
    x2 = jax.random.normal(jax.random.PRNGKey(1), (B2, D_IN), jnp.float32)
    out2 = jax.block_until_ready(mlp_only_forward(x2, params))
    ref2 = reference_forward(x2, params)
    assert out2.shape == (B2, OUT_DIM)
    assert jnp.allclose(out2, ref2, atol=1e-4, rtol=1e-4), "mismatch vs JAX reference (B=520)"

    print("KERNEL_OK")
</pallas_src>

<mosaic_0001>
module attributes {stable_mosaic.version = 11 : i64} {
  func.func @mlp_only_kernel(%arg0: i32, %arg1: memref<8x32xf32, #tpu.memory_space<vmem>>, %arg2: memref<32x128xf32, #tpu.memory_space<vmem>>, %arg3: memref<1x128xf32, #tpu.memory_space<vmem>>, %arg4: memref<128x64xf32, #tpu.memory_space<vmem>>, %arg5: memref<1x64xf32, #tpu.memory_space<vmem>>, %arg6: memref<64x128xf32, #tpu.memory_space<vmem>>, %arg7: memref<1x128xf32, #tpu.memory_space<vmem>>, %arg8: memref<8x2xf32, #tpu.memory_space<vmem>>) attributes {dimension_semantics = [#tpu.dimension_semantics<parallel>], iteration_bounds = array<i64: 1>, scalar_prefetch = 0 : i64, scratch_operands = 0 : i64, tpu.core_type = #tpu.core_type<tc>, window_params = [{transform_indices = @transform_0, window_bounds = array<i64: 8, 32>}, {pipeline_mode = #tpu.pipeline_mode<synchronous>, transform_indices = @transform_1, window_bounds = array<i64: 32, 128>}, {pipeline_mode = #tpu.pipeline_mode<synchronous>, transform_indices = @transform_2, window_bounds = array<i64: 1, 128>}, {pipeline_mode = #tpu.pipeline_mode<synchronous>, transform_indices = @transform_3, window_bounds = array<i64: 128, 64>}, {pipeline_mode = #tpu.pipeline_mode<synchronous>, transform_indices = @transform_4, window_bounds = array<i64: 1, 64>}, {pipeline_mode = #tpu.pipeline_mode<synchronous>, transform_indices = @transform_5, window_bounds = array<i64: 64, 128>}, {pipeline_mode = #tpu.pipeline_mode<synchronous>, transform_indices = @transform_6, window_bounds = array<i64: 1, 128>}, {transform_indices = @transform_7, window_bounds = array<i64: 8, 2>}]} {
    %c0 = arith.constant 0 : index
    %c0_0 = arith.constant 0 : index
    %0 = vector.load %arg1[%c0, %c0_0] : memref<8x32xf32, #tpu.memory_space<vmem>>, vector<8x32xf32>
    %c0_1 = arith.constant 0 : index
    %c0_2 = arith.constant 0 : index
    %1 = vector.load %arg2[%c0_1, %c0_2] : memref<32x128xf32, #tpu.memory_space<vmem>>, vector<32x128xf32>
    %cst = arith.constant dense<0.000000e+00> : vector<8x128xf32>
    %2 = tpu.matmul %0, %1, %cst {dimension_numbers = #tpu.dot_dimension_numbers<[1], [0], [0], [1], [0, 0, 1, 1], [], []>} : vector<8x32xf32>, vector<32x128xf32>, vector<8x128xf32> -> vector<8x128xf32>
    %c0_3 = arith.constant 0 : index
    %c0_4 = arith.constant 0 : index
    %3 = vector.load %arg3[%c0_3, %c0_4] : memref<1x128xf32, #tpu.memory_space<vmem>>, vector<1x128xf32>
    %4 = vector.broadcast %3 : vector<1x128xf32> to vector<8x128xf32>
    %5 = arith.addf %2, %4 : vector<8x128xf32>
    %cst_5 = arith.constant 0.000000e+00 : f32
    %6 = vector.broadcast %cst_5 : f32 to vector<8x128xf32>
    %7 = arith.maximumf %5, %6 : vector<8x128xf32>
    %c0_6 = arith.constant 0 : index
    %c0_7 = arith.constant 0 : index
    %8 = vector.load %arg4[%c0_6, %c0_7] : memref<128x64xf32, #tpu.memory_space<vmem>>, vector<128x64xf32>
    %cst_8 = arith.constant dense<0.000000e+00> : vector<8x64xf32>
    %9 = tpu.matmul %7, %8, %cst_8 {dimension_numbers = #tpu.dot_dimension_numbers<[1], [0], [0], [1], [0, 0, 1, 1], [], []>} : vector<8x128xf32>, vector<128x64xf32>, vector<8x64xf32> -> vector<8x64xf32>
    %c0_9 = arith.constant 0 : index
    %c0_10 = arith.constant 0 : index
    %10 = vector.load %arg5[%c0_9, %c0_10] : memref<1x64xf32, #tpu.memory_space<vmem>>, vector<1x64xf32>
    %11 = vector.broadcast %10 : vector<1x64xf32> to vector<8x64xf32>
    %12 = arith.addf %9, %11 : vector<8x64xf32>
    %cst_11 = arith.constant 0.000000e+00 : f32
    %13 = vector.broadcast %cst_11 : f32 to vector<8x64xf32>
    %14 = arith.maximumf %12, %13 : vector<8x64xf32>
    %c0_12 = arith.constant 0 : index
    %c0_13 = arith.constant 0 : index
    %15 = vector.load %arg6[%c0_12, %c0_13] : memref<64x128xf32, #tpu.memory_space<vmem>>, vector<64x128xf32>
    %cst_14 = arith.constant dense<0.000000e+00> : vector<8x128xf32>
    %16 = tpu.matmul %14, %15, %cst_14 {dimension_numbers = #tpu.dot_dimension_numbers<[1], [0], [0], [1], [0, 0, 1, 1], [], []>} : vector<8x64xf32>, vector<64x128xf32>, vector<8x128xf32> -> vector<8x128xf32>
    %c0_15 = arith.constant 0 : index
    %c0_16 = arith.constant 0 : index
    %17 = vector.load %arg7[%c0_15, %c0_16] : memref<1x128xf32, #tpu.memory_space<vmem>>, vector<1x128xf32>
    %18 = vector.broadcast %17 : vector<1x128xf32> to vector<8x128xf32>
    %19 = arith.addf %16, %18 : vector<8x128xf32>
    %20 = vector.extract_strided_slice %19 {offsets = [0, 0], sizes = [8, 2], strides = [1, 1]} : vector<8x128xf32> to vector<8x2xf32>
    %c0_17 = arith.constant 0 : index
    %c0_18 = arith.constant 0 : index
    %21 = vector.load %arg8[%c0_17, %c0_18] : memref<8x2xf32, #tpu.memory_space<vmem>>, vector<8x2xf32>
    tpu.vector_store %arg8[%c0_17, %c0_18], %20 {strides = array<i32>} : memref<8x2xf32, #tpu.memory_space<vmem>>, vector<8x2xf32>,
    return
  }
  func.func @transform_0(%arg0: i32) -> (i32, i32) {
    %c0_i32 = arith.constant 0 : i32
    %c0_i32_0 = arith.constant 0 : i32
    return %arg0, %c0_i32 : i32, i32
  }
  func.func @transform_1(%arg0: i32) -> (i32, i32) {
    %c0_i32 = arith.constant 0 : i32
    %c0_i32_0 = arith.constant 0 : i32
    %c0_i32_1 = arith.constant 0 : i32
    return %c0_i32, %c0_i32_0 : i32, i32
  }
  func.func @transform_2(%arg0: i32) -> (i32, i32) {
    %c0_i32 = arith.constant 0 : i32
    %c0_i32_0 = arith.constant 0 : i32
    %c0_i32_1 = arith.constant 0 : i32
    return %c0_i32, %c0_i32_0 : i32, i32
  }
  func.func @transform_3(%arg0: i32) -> (i32, i32) {
    %c0_i32 = arith.constant 0 : i32
    %c0_i32_0 = arith.constant 0 : i32
    %c0_i32_1 = arith.constant 0 : i32
    return %c0_i32, %c0_i32_0 : i32, i32
  }
  func.func @transform_4(%arg0: i32) -> (i32, i32) {
    %c0_i32 = arith.constant 0 : i32
    %c0_i32_0 = arith.constant 0 : i32
    %c0_i32_1 = arith.constant 0 : i32
    return %c0_i32, %c0_i32_0 : i32, i32
  }
  func.func @transform_5(%arg0: i32) -> (i32, i32) {
    %c0_i32 = arith.constant 0 : i32
    %c0_i32_0 = arith.constant 0 : i32
    %c0_i32_1 = arith.constant 0 : i32
    return %c0_i32, %c0_i32_0 : i32, i32
  }
  func.func @transform_6(%arg0: i32) -> (i32, i32) {
    %c0_i32 = arith.constant 0 : i32
    %c0_i32_0 = arith.constant 0 : i32
    %c0_i32_1 = arith.constant 0 : i32
    return %c0_i32, %c0_i32_0 : i32, i32
  }
  func.func @transform_7(%arg0: i32) -> (i32, i32) {
    %c0_i32 = arith.constant 0 : i32
    %c0_i32_0 = arith.constant 0 : i32
    return %arg0, %c0_i32 : i32, i32
  }
}

</mosaic_0001>

<bundles_post_ra>
// kernel: mlp_only_forward.1
= control target key start
LH: loop header
LB: loop body
LE: loop exit
PB: predicated region body
PF: predicated region fallthrough
CT: control target
= control target key end

     0   :  { %v448_v0 = vmov 0.0|0.0   ;;  %vm449_vm0 = vmmov 0   ;;  %v450_v4 = vmov 0.0   ;;  %vm38_vm1 = vcmask 261120   ;;  %s607_s1 = inlined_call_operand.vmem [shape: f32[32,128], index: 1, kind: input, shape index: {}]   ;;  %s608_s3 = inlined_call_operand.vmem [shape: f32[128,64], index: 3, kind: input, shape index: {}]   ;;  %s609_s0 = inlined_call_operand.vmem [shape: f32[8,32], index: 0, kind: input, shape index: {}]   ;;  %s610_s5 = inlined_call_operand.vmem [shape: f32[64,128], index: 5, kind: input, shape index: {}]   ;;  %s611_s2 = inlined_call_operand.vmem [shape: f32[1,128], index: 2, kind: input, shape index: {}]   ;;  %s612_s4 = inlined_call_operand.vmem [shape: f32[1,64], index: 4, kind: input, shape index: {}]   ;;  %s613_s6 = inlined_call_operand.vmem [shape: f32[1,128], index: 6, kind: input, shape index: {}]   ;;  %s614_s7 = inlined_call_operand.vmem [shape: f32[8,2], index: 7, kind: output, shape index: {}]  }
   0x1   :  { %403 = vmatprep.subr.bf16.mxu0 %v448_v0  ;;  %v27_v1 = vld [vmem:[%s607_s1] sm:$0xff]  ;;  %v28_v2 = vld [vmem:[%s607_s1 + $0x8] sm:$0xff]  ;;  %v29_v3 = vld [vmem:[%s607_s1 + $0x10] sm:$0xff]  ;;  %346 = vmatprep.mubr.msk.f32.mxu0 %vm449_vm0, %v450_v4  ;;  %vm222_vm2 = vcmask 523264   ;;  %vm296_vm3 = vcmask 15360  }
   0x2   :  { %v404_v5 = vpack.c.bf16 %v28_v2, %v27_v1  ;;  %v30_v6 = vld [vmem:[%s607_s1 + $0x18] sm:$0xff]  ;;  %409 = vmatprep.subr.bf16.mxu1 %v448_v0  ;;  %v113_v7 = vld [vmem:[%s608_s3] sm:$0xff]  ;;  %381 = vmatprep.mubr.msk.f32.mxu1 %vm449_vm0, %v450_v4  ;;  %v114_v8 = vld [vmem:[%s608_s3 + $0x8] sm:$0xff] }
   0x3   :  { %v115_v9 = vld [vmem:[%s608_s3 + $0x10] sm:$0xff]  ;;  %v116_v10 = vld [vmem:[%s608_s3 + $0x18] sm:$0xff]  ;;  %v407_v11 = vpack.c.bf16 %v30_v6, %v29_v3  ;;  %v410_v12 = vpack.c.bf16 %v114_v8, %v113_v7  ;;  %v117_v14 = vld [vmem:[%s608_s3 + $0x20] sm:$0xff] }
   0x4   :  { %405 = vmatpush3.bf16.msra.mxu0 %v404_v5  ;;  %v413_v13 = vpack.c.bf16 %v116_v10, %v115_v9  ;;  %v118_v15 = vld [vmem:[%s608_s3 + $0x28] sm:$0xff]  ;;  %v26_v16 = vld [vmem:[%s609_s0] sm:$0xff]  ;;  %v119_v18 = vld [vmem:[%s608_s3 + $0x30] sm:$0xff] }
   0x5   :  { %406 = vmatprep.subr.bf16.mxu0 %v448_v0  ;;  %411 = vmatpush3.bf16.msra.mxu1 %v410_v12  ;;  %v416_v17 = vpack.c.bf16 %v118_v15, %v117_v14  ;;  %v120_v19 = vld [vmem:[%s608_s3 + $0x38] sm:$0xff]  ;;  %v121_v21 = vld [vmem:[%s608_s3 + $0x40] sm:$0xff]  ;;  %v122_v22 = vld [vmem:[%s608_s3 + $0x48] sm:$0xff] }
   0x6   :  { %412 = vmatprep.subr.bf16.mxu1 %v448_v0  ;;  %v419_v20 = vpack.c.bf16 %v120_v19, %v119_v18  ;;  %v422_v23 = vpack.c.bf16 %v122_v22, %v121_v21  ;;  %v123_v24 = vld [vmem:[%s608_s3 + $0x50] sm:$0xff]  ;;  %v124_v25 = vld [vmem:[%s608_s3 + $0x58] sm:$0xff]  ;;  %v125_v27 = vld [vmem:[%s608_s3 + $0x60] sm:$0xff] }
   0x7   :  { %v425_v26 = vpack.c.bf16 %v124_v25, %v123_v24  ;;  %v126_v28 = vld [vmem:[%s608_s3 + $0x68] sm:$0xff]  ;;  %v127_v30 = vld [vmem:[%s608_s3 + $0x70] sm:$0xff]  ;;  %v128_v31 = vld [vmem:[%s608_s3 + $0x78] sm:$0xff] }
   0x8   :  { %408 = vmatpush3.bf16.msra.mxu0 %v407_v11  ;;  %v428_v29 = vpack.c.bf16 %v126_v28, %v125_v27  ;;  %v431_v32 = vpack.c.bf16 %v128_v31, %v127_v30  ;;  %v207_v33 = vld [vmem:[%s610_s5] sm:$0xff]  ;;  %v208_v34 = vld [vmem:[%s610_s5 + $0x8] sm:$0xff]  ;;  %v209_v35 = vld [vmem:[%s610_s5 + $0x10] sm:$0xff] }
   0x9   :  { %433 = vmatprep.subr.bf16.mxu0 %v448_v0  ;;  %414 = vmatpush3.bf16.msra.mxu1 %v413_v13  ;;  %v434_v36 = vpack.c.bf16 %v208_v34, %v207_v33  ;;  %v210_v37 = vld [vmem:[%s610_s5 + $0x18] sm:$0xff]  ;;  %v211_v39 = vld [vmem:[%s610_s5 + $0x20] sm:$0xff]  ;;  %v212_v40 = vld [vmem:[%s610_s5 + $0x28] sm:$0xff] }
   0xa   :  { %415 = vmatprep.subr.bf16.mxu1 %v448_v0  ;;  %v437_v38 = vpack.c.bf16 %v210_v37, %v209_v35  ;;  %v440_v41 = vpack.c.bf16 %v212_v40, %v211_v39  ;;  %v302_v42 = vld [vmem:[%s611_s2] ss:$0 sm:$0xff]  ;;  %v213_v47 = vld [vmem:[%s610_s5 + $0x30] sm:$0xff]  ;;  %v214_v48 = vld [vmem:[%s610_s5 + $0x38] sm:$0xff] }
   0xb   :  { %347 = vmatmul.mubr.msk.f32.vlgmr.msra.gmra.mrb[0].mxu0 %vm38_vm1, %v26_v16  ;;  %v443_v49 = vpack.c.bf16 %v214_v48, %v213_v47  ;;  %v304_v50 = vld [vmem:[%s612_s4] ss:$0 sm:$0xff] }
   0xc   :  { %400 = vmatprep.mubr.msk.f32.mxu0 %vm449_vm0, %v450_v4  ;;  %435 = vmatpush3.bf16.msra.mxu0 %v434_v36  ;;  %v305_v55 = vld [vmem:[%s613_s6] ss:$0 sm:$0xff] }
   0xd   :  { %417 = vmatpush3.bf16.msra.mxu1 %v416_v17  ;;  %436 = vmatprep.subr.bf16.mxu0 %v448_v0 }
   0xe   :  { %418 = vmatprep.subr.bf16.mxu1 %v448_v0 }
  0x10   :  { %438 = vmatpush3.bf16.msra.mxu0 %v437_v38 }
  0x11   :  { %420 = vmatpush3.bf16.msra.mxu1 %v419_v20  ;;  %439 = vmatprep.subr.bf16.mxu0 %v448_v0 }
  0x12   :  { %421 = vmatprep.subr.bf16.mxu1 %v448_v0 }
  0x14   :  { %441 = vmatpush3.bf16.msra.mxu0 %v440_v41 }
  0x15   :  { %423 = vmatpush3.bf16.msra.mxu1 %v422_v23  ;;  %442 = vmatprep.subr.bf16.mxu0 %v448_v0 }
  0x16   :  { %424 = vmatprep.subr.bf16.mxu1 %v448_v0 }
  0x18   :  { %444 = vmatpush3.bf16.msra.mxu0 %v443_v49 }
  0x19   :  { %426 = vmatpush3.bf16.msra.mxu1 %v425_v26 }
  0x1a   :  { %427 = vmatprep.subr.bf16.mxu1 %v448_v0 }
  0x1d   :  { %429 = vmatpush3.bf16.msra.mxu1 %v428_v29 }
  0x1e   :  { %430 = vmatprep.subr.bf16.mxu1 %v448_v0 }
  0x21   :  { %432 = vmatpush3.bf16.msra.mxu1 %v431_v32 }
  0xde   :  { %v108_v43 = vpop.f32.mrb[0].mxu0 }
  0xdf   :  { %v109_v44 = vadd.f32 %v302_v42, %v108_v43  ;;  %v348_v45 = vpop.f32.mrb[1].mxu0 }
  0xe1   :  { %v112_v46 = vmax.f32 %v109_v44, 0.0 }
  0xe3   :  { %382 = vmatmul.mubr.f32.vlgmr.msra.gmra.mrb[0].mxu1 %v112_v46 }
 0x1b6   :  { %v202_v51 = vpop.f32.mrb[0].mxu1 }
 0x1b7   :  { %v203_v52 = vadd.f32 %v304_v50, %v202_v51  ;;  %v383_v53 = vpop.f32.mrb[1].mxu1 }
 0x1b9   :  { %v206_v54 = vmax.f32 %v203_v52, 0.0 }
 0x1bb   :  { %401 = vmatmul.mubr.msk.f32.vlgmr.msra.gmra.mrb[2].mxu0 %vm222_vm2, %v206_v54 }
 0x28e   :  { %v292_v56 = vpop.f32.mrb[2].mxu0 }
 0x28f   :  { %v293_v57 = vadd.f32 %v305_v55, %v292_v56  ;;  %v402_v58 = vpop.f32.mrb[3].mxu0 }
 0x291   :  { %297 = vst.msk [vmem:[%s614_s7] sm:$0xff] %vm296_vm3, %v293_v57 }

</bundles_post_ra>
